<compile_context>
chip_gen: v5e
topology: v5e:2x2
jax: 0.10.0
libtpu: 0.0.40
codegen_flags: <defaults>
</compile_context>

<pallas_src>
import functools

import jax
import jax.numpy as jnp
from jax.experimental import pallas as pl
from jax.experimental.pallas import tpu as pltpu


# ----------------------------------------------------------------------------
# Fused kernel: block-diag batched GNN towers + mean-pool + head + sigmoid
# ----------------------------------------------------------------------------
def iedr_fused_kernel(emb_ref, adj_ref, pool_ref, wts_ref, bias_ref, wsum_ref,
                      y_ref, *, bg, bgp, d, p, o_half):
    # emb_ref : (R, W)      bf16  R = 3*Bg*N rows (tower, graph, node);
    #                             tower t's D features in lanes [t*P : t*P+D]
    # adj_ref : (R, R)      bf16  block-diagonal (A + I) per (tower, graph)
    # pool_ref: (3*BgP, R)  bf16  mean-pool selector (1/N), 8-row aligned
    # wts_ref : (4, W, W)   bf16  [gnn_W1 | gnn_W2 | head_W1 | head_W2], each
    #                             block-diagonal across towers / user-item
    # bias_ref: (4, W)      f32   matching biases (lane-concatenated, 0-padded)
    # wsum_ref: (Bg, 1)     f32   summed node weights (user+item+cont) / graph
    # y_ref   : (Bg, 1)     f32   sigmoid output
    f32, bf16 = jnp.float32, jnp.bfloat16

    emb = emb_ref[...]
    adj = adj_ref[...]
    pool = pool_ref[...]

    # --- one message-passing step for all 3 towers x Bg graphs (1 MXU call) ---
    # TODO(synk): the GNN class body is not given in the reference; we use one
    # (A + I) @ x step followed by Linear-ReLU-Linear.
    h0 = jnp.dot(adj, emb, preferred_element_type=f32)                   # [R, W]

    # --- GNN Linear-ReLU-Linear, lane-fused block-diag over 3 towers ---------
    h1 = jnp.dot(h0.astype(bf16), wts_ref[0], preferred_element_type=f32)
    h1 = jnp.maximum(h1 + bias_ref[0:1, :], 0.0)                         # [R, W]
    h2 = jnp.dot(h1.astype(bf16), wts_ref[1], preferred_element_type=f32)
    h2 = h2 + bias_ref[1:2, :]                                           # [R, W]
    # Lanes outside a row's own tower block carry broadcast-bias garbage; it
    # cannot mix back (strictly block-diag weights) and is never read below.

    # --- global mean pool for all towers/graphs (1 MXU call) -----------------
    pooled = jnp.dot(pool, h2.astype(bf16),
                     preferred_element_type=f32)                  # [3*BgP, W]

    g_user = pooled[0 * bgp:0 * bgp + bg, 0 * p:0 * p + d]        # [Bg, D]
    g_item = pooled[1 * bgp:1 * bgp + bg, 1 * p:1 * p + d]
    g_cont = pooled[2 * bgp:2 * bgp + bg, 2 * p:2 * p + d]

    # args.merge == 'prod'
    u_in = g_user * g_cont
    i_in = g_item * g_cont
    if p > d:                                # static pad to lane-block width P
        zpad = jnp.zeros((bg, p - d), f32)
        u_in = jnp.concatenate([u_in, zpad], axis=1)
        i_in = jnp.concatenate([i_in, zpad], axis=1)
    head_in = jnp.concatenate([u_in, i_in, jnp.zeros((bg, p), f32)],
                              axis=1)                              # [Bg, W]

    # --- user_f | item_f head, lane-fused block-diag (2 MXU calls) -----------
    hh = jnp.dot(head_in.astype(bf16), wts_ref[2], preferred_element_type=f32)
    hh = jnp.maximum(hh + bias_ref[2:3, :], 0.0)
    hv = jnp.dot(hh.astype(bf16), wts_ref[3], preferred_element_type=f32)
    hv = hv + bias_ref[3:4, :]                                     # [Bg, W]

    # res = sum((u_in+u_ex) * (i_in+i_ex)); the args.split half-split is folded
    # into the second head linear in the glue.
    u_fold = hv[:, 0:o_half]
    i_fold = hv[:, p:p + o_half]
    res = jnp.sum(u_fold * i_fold, axis=1, keepdims=True)          # [Bg, 1]
    y_ref[...] = jax.nn.sigmoid(res + wsum_ref[...])


def run_iedr_fused(emb_all, adj_all, pool, wts_all, bias_all, wsum_all,
                   *, d, p, o_half):
    G, R, W = emb_all.shape
    Bg = wsum_all.shape[1]
    BgP = pool.shape[0] // 3
    kernel = functools.partial(iedr_fused_kernel, bg=Bg, bgp=BgP, d=d, p=p,
                               o_half=o_half)
    y = pl.pallas_call(
        kernel,
        out_shape=jax.ShapeDtypeStruct((G, Bg, 1), jnp.float32),
        grid=(G,),
        in_specs=[
            pl.BlockSpec((None, R, W), lambda g: (g, 0, 0)),      # emb
            pl.BlockSpec((None, R, R), lambda g: (g, 0, 0)),      # adj
            pl.BlockSpec(pool.shape, lambda g: (0, 0)),           # pool matrix
            pl.BlockSpec(wts_all.shape, lambda g: (0, 0, 0)),     # packed W
            pl.BlockSpec(bias_all.shape, lambda g: (0, 0)),       # packed b
            pl.BlockSpec((None, Bg, 1), lambda g: (g, 0, 0)),     # wsum
        ],
        out_specs=pl.BlockSpec((None, Bg, 1), lambda g: (g, 0, 0)),
        compiler_params=pltpu.CompilerParams(
            dimension_semantics=("parallel",)),
    )(emb_all, adj_all, pool, wts_all, bias_all, wsum_all)
    return y.reshape(-1)                                           # [B]


# ----------------------------------------------------------------------------
# IEDR forward (gather / layout glue in plain JAX, hot path in the kernel)
# ----------------------------------------------------------------------------
def _block_diag(blocks):
    rows = sum(b.shape[0] for b in blocks)
    cols = sum(b.shape[1] for b in blocks)
    out = jnp.zeros((rows, cols), blocks[0].dtype)
    r = c = 0
    for b in blocks:
        out = out.at[r:r + b.shape[0], c:c + b.shape[1]].set(b)
        r += b.shape[0]
        c += b.shape[1]
    return out


def iedr_forward(params, x_user, adj_user, x_item, adj_item, x_cont, adj_cont,
                 num_groups=2):
    B, N = x_user.shape
    D = params["feat_emb"].shape[1]
    H = params["user_gnn"][0].shape[1]
    O = params["user_f"][2].shape[1]
    P = max(D, H)                    # per-tower lane-block width
    W = 3 * P                        # fused lane width
    G = num_groups
    assert B % G == 0
    Bg = B // G
    R = 3 * Bg * N                   # rows per group (towers x graphs x nodes)
    assert O % 2 == 0 and O // 2 <= P

    # ---- embedding / node-weight gather (fuses into the XLA gather) --------
    def embed(x):
        emb = jnp.take(params["feat_emb"], x, axis=0)             # [B, N, D]
        w = jnp.take(params["node_w"][:, 0], x, axis=0)           # [B, N]
        # TODO(synk): real PyG batches have variable node counts; a node mask
        # would be needed for the mean pool / weight sum with padding.
        return emb, jnp.sum(w, axis=1)

    emb_u, w_u = embed(x_user)
    emb_i, w_i = embed(x_item)
    emb_c, w_c = embed(x_cont)

    # ---- row-stack towers, lane-block features: [G, R, W] -------------------
    def lane_place(emb, t):          # [B,N,D] -> [B,N,W], feats at [tP:tP+D]
        return jnp.pad(emb, ((0, 0), (0, 0), (t * P, W - t * P - D)))

    emb_stack = jnp.stack([lane_place(emb_u, 0), lane_place(emb_i, 1),
                           lane_place(emb_c, 2)], axis=0)         # [3,B,N,W]
    emb_all = (emb_stack.reshape(3, G, Bg, N, W)
               .transpose(1, 0, 2, 3, 4)
               .reshape(G, R, W).astype(jnp.bfloat16))

    # ---- block-diagonal adjacency with the GNN self-loop (+I) folded in -----
    adj_stack = jnp.stack([adj_user, adj_item, adj_cont], axis=0)  # [3,B,N,N]
    adj_stack = adj_stack + jnp.eye(N, dtype=adj_stack.dtype)      # fold +x
    adjg = (adj_stack.reshape(3, G, Bg, N, N)
            .transpose(1, 0, 2, 3, 4)
            .reshape(G, 3 * Bg, N, N))
    eye_k = jnp.eye(3 * Bg, dtype=adjg.dtype)
    adj_all = (jnp.einsum("kc,gknm->gkncm", eye_k, adjg)
               .reshape(G, R, R).astype(jnp.bfloat16))

    # ---- mean-pool selector, shared across groups, 8-row aligned ------------
    BgP = ((Bg + 7) // 8) * 8
    blk = jnp.repeat(jnp.eye(Bg, dtype=jnp.float32), N, axis=1) / N
    pool = jnp.zeros((3 * BgP, R), jnp.float32)
    for t in range(3):
        pool = pool.at[t * BgP:t * BgP + Bg,
                       t * Bg * N:(t + 1) * Bg * N].set(blk)
    pool = pool.astype(jnp.bfloat16)

    # ---- node-weight global_add_pool, summed across the three towers --------
    wsum_all = (w_u + w_i + w_c).reshape(G, Bg, 1).astype(jnp.float32)

    # ---- pack all weights / biases into two buffers (lane-block-diag) -------
    def pad_sq(w):                    # [a, b] -> [P, P]
        return jnp.pad(w, ((0, P - w.shape[0]), (0, P - w.shape[1])))

    def pad_row(b):                   # [1, a] -> [1, P]
        return jnp.pad(b, ((0, 0), (0, P - b.shape[1])))

    towers = ("user_gnn", "item_gnn", "cont_gnn")
    gw1 = _block_diag([pad_sq(params[k][0]) for k in towers])      # [W, W]
    gw2 = _block_diag([pad_sq(params[k][2]) for k in towers])      # [W, W]
    gb1 = jnp.concatenate([pad_row(params[k][1]) for k in towers], axis=1)
    gb2 = jnp.concatenate([pad_row(params[k][3]) for k in towers], axis=1)

    # fold the args.split half-split into the 2nd linear of user_f / item_f
    def fold_split(w2, b2):
        half = w2.shape[1] // 2
        return w2[:, :half] + w2[:, half:], b2[:, :half] + b2[:, half:]

    uw1, ub1, uw2, ub2 = params["user_f"]
    iw1, ib1, iw2, ib2 = params["item_f"]
    uw2f, ub2f = fold_split(uw2, ub2)
    iw2f, ib2f = fold_split(iw2, ib2)

    zP = jnp.zeros((P, P), jnp.float32)
    z1 = jnp.zeros((1, P), jnp.float32)
    hw1 = _block_diag([pad_sq(uw1), pad_sq(iw1), zP])              # [W, W]
    hw2 = _block_diag([pad_sq(uw2f), pad_sq(iw2f), zP])            # [W, W]
    hb1 = jnp.concatenate([pad_row(ub1), pad_row(ib1), z1], axis=1)
    hb2 = jnp.concatenate([pad_row(ub2f), pad_row(ib2f), z1], axis=1)

    wts_all = jnp.stack([gw1, gw2, hw1, hw2]).astype(jnp.bfloat16)   # [4,W,W]
    bias_all = jnp.concatenate([gb1, gb2, hb1, hb2],
                               axis=0).astype(jnp.float32)           # [4,W]

    y = run_iedr_fused(emb_all, adj_all, pool, wts_all, bias_all, wsum_all,
                       d=D, p=P, o_half=O // 2)

    # TODO(synk): ContrastiveModel and disent_MutualMin are not defined in the
    # reference source; their loss / pair outputs are returned as placeholders.
    user_cl_loss = 0.0
    item_cl_loss = 0.0
    user_dis_pair = [0.0, 0.0]
    item_dis_pair = [0.0, 0.0]
    return y, user_cl_loss, item_cl_loss, user_dis_pair, item_dis_pair


# ----------------------------------------------------------------------------
# deterministic parameter / input construction
# ----------------------------------------------------------------------------
def make_params(key, n_features, dim, hidden, out_dim):
    n_keys = 2 + 5 * 4                      # feat_emb, node_w + 5 MLPs x 4
    it = iter(jax.random.split(key, n_keys))

    def mlp(din, dh, dout):
        return (0.1 * jax.random.normal(next(it), (din, dh), jnp.float32),
                0.1 * jax.random.normal(next(it), (1, dh), jnp.float32),
                0.1 * jax.random.normal(next(it), (dh, dout), jnp.float32),
                0.1 * jax.random.normal(next(it), (1, dout), jnp.float32))

    params = {
        # nn.Embedding(n_features+1, dim), weight ~ N(1, 1)
        "feat_emb": 1.0 + jax.random.normal(next(it), (n_features + 1, dim),
                                            jnp.float32),
        # nn.Embedding(n_features+1, 1), weight ~ N(0, 0.01)
        "node_w": 0.01 * jax.random.normal(next(it), (n_features + 1, 1),
                                           jnp.float32),
        "user_gnn": mlp(dim, hidden, dim),
        "item_gnn": mlp(dim, hidden, dim),
        "cont_gnn": mlp(dim, hidden, dim),
        "user_f": mlp(dim, hidden, out_dim),
        "item_f": mlp(dim, hidden, out_dim),
    }
    return params


def make_graph_batch(key, B, N, n_features):
    kx, ka = jax.random.split(key)
    x = jax.random.randint(kx, (B, N), 1, n_features + 1, jnp.int32)
    # TODO(synk): PyG edge_index (COO [2, E]) -> dense per-graph adjacency
    # conversion is done in glue as a random symmetric 0/1 matrix here.
    a = (jax.random.uniform(ka, (B, N, N)) < 0.2).astype(jnp.float32)
    adj = jnp.clip(a + jnp.transpose(a, (0, 2, 1)), 0.0, 1.0)
    return x, adj


if __name__ == "__main__":
    B, N = 8, 16          # graphs per batch, nodes per graph
    DIM, HIDDEN, OUT = 32, 32, 16
    N_FEATURES = 100

    key = jax.random.PRNGKey(0)
    kp, ku, ki, kc = jax.random.split(key, 4)

    params = make_params(kp, N_FEATURES, DIM, HIDDEN, OUT)
    x_user, adj_user = make_graph_batch(ku, B, N, N_FEATURES)
    x_item, adj_item = make_graph_batch(ki, B, N, N_FEATURES)
    x_cont, adj_cont = make_graph_batch(kc, B, N, N_FEATURES)

    fwd = jax.jit(functools.partial(iedr_forward, params))
    y, ucl, icl, udp, idp = fwd(x_user, adj_user, x_item, adj_item,
                                x_cont, adj_cont)
    y = jax.block_until_ready(y)

    assert y.shape == (B,)
    assert bool(jnp.all((y >= 0.0) & (y <= 1.0)))
    print("KERNEL_OK")
</pallas_src>

<mosaic_0001>
module attributes {stable_mosaic.version = 11 : i64} {
  func.func @iedr_fused_kernel(%arg0: i32, %arg1: memref<1x192x96xbf16, #tpu.memory_space<vmem>>, %arg2: memref<1x192x192xbf16, #tpu.memory_space<vmem>>, %arg3: memref<24x192xbf16, #tpu.memory_space<vmem>>, %arg4: memref<4x96x96xbf16, #tpu.memory_space<vmem>>, %arg5: memref<4x96xf32, #tpu.memory_space<vmem>>, %arg6: memref<1x4x1xf32, #tpu.memory_space<vmem>>, %arg7: memref<1x4x1xf32, #tpu.memory_space<vmem>>) attributes {dimension_semantics = [#tpu.dimension_semantics<parallel>], iteration_bounds = array<i64: 2>, scalar_prefetch = 0 : i64, scratch_operands = 0 : i64, tpu.core_type = #tpu.core_type<tc>, window_params = [{transform_indices = @transform_0, window_bounds = array<i64: 1, 192, 96>}, {transform_indices = @transform_1, window_bounds = array<i64: 1, 192, 192>}, {pipeline_mode = #tpu.pipeline_mode<synchronous>, transform_indices = @transform_2, window_bounds = array<i64: 24, 192>}, {pipeline_mode = #tpu.pipeline_mode<synchronous>, transform_indices = @transform_3, window_bounds = array<i64: 4, 96, 96>}, {pipeline_mode = #tpu.pipeline_mode<synchronous>, transform_indices = @transform_4, window_bounds = array<i64: 4, 96>}, {transform_indices = @transform_5, window_bounds = array<i64: 1, 4, 1>}, {transform_indices = @transform_6, window_bounds = array<i64: 1, 4, 1>}]} {
    %c0 = arith.constant 0 : index
    %c0_0 = arith.constant 0 : index
    %c0_1 = arith.constant 0 : index
    %0 = vector.load %arg1[%c0, %c0_0, %c0_1] : memref<1x192x96xbf16, #tpu.memory_space<vmem>>, vector<1x192x96xbf16>
    %1 = vector.shape_cast %0 : vector<1x192x96xbf16> to vector<192x96xbf16>
    %c0_2 = arith.constant 0 : index
    %c0_3 = arith.constant 0 : index
    %c0_4 = arith.constant 0 : index
    %2 = vector.load %arg2[%c0_2, %c0_3, %c0_4] : memref<1x192x192xbf16, #tpu.memory_space<vmem>>, vector<1x192x192xbf16>
    %3 = vector.shape_cast %2 : vector<1x192x192xbf16> to vector<192x192xbf16>
    %c0_5 = arith.constant 0 : index
    %c0_6 = arith.constant 0 : index
    %4 = vector.load %arg3[%c0_5, %c0_6] : memref<24x192xbf16, #tpu.memory_space<vmem>>, vector<24x192xbf16>
    %cst = arith.constant dense<0.000000e+00> : vector<192x96xf32>
    %5 = tpu.matmul %3, %1, %cst {dimension_numbers = #tpu.dot_dimension_numbers<[1], [0], [0], [1], [0, 0, 1, 1], [], []>} : vector<192x192xbf16>, vector<192x96xbf16>, vector<192x96xf32> -> vector<192x96xf32>
    %6 = arith.truncf %5 : vector<192x96xf32> to vector<192x96xbf16>
    %c0_7 = arith.constant 0 : index
    %c0_8 = arith.constant 0 : index
    %c0_9 = arith.constant 0 : index
    %7 = vector.load %arg4[%c0_7, %c0_8, %c0_9] : memref<4x96x96xbf16, #tpu.memory_space<vmem>>, vector<1x96x96xbf16>
    %8 = vector.shape_cast %7 : vector<1x96x96xbf16> to vector<96x96xbf16>
    %cst_10 = arith.constant dense<0.000000e+00> : vector<192x96xf32>
    %9 = tpu.matmul %6, %8, %cst_10 {dimension_numbers = #tpu.dot_dimension_numbers<[1], [0], [0], [1], [0, 0, 1, 1], [], []>} : vector<192x96xbf16>, vector<96x96xbf16>, vector<192x96xf32> -> vector<192x96xf32>
    %c0_11 = arith.constant 0 : index
    %c0_12 = arith.constant 0 : index
    %10 = vector.load %arg5[%c0_11, %c0_12] : memref<4x96xf32, #tpu.memory_space<vmem>>, vector<1x96xf32>
    %11 = vector.broadcast %10 : vector<1x96xf32> to vector<192x96xf32>
    %12 = arith.addf %9, %11 : vector<192x96xf32>
    %cst_13 = arith.constant 0.000000e+00 : f32
    %13 = vector.broadcast %cst_13 : f32 to vector<192x96xf32>
    %14 = arith.maximumf %12, %13 : vector<192x96xf32>
    %15 = arith.truncf %14 : vector<192x96xf32> to vector<192x96xbf16>
    %c1 = arith.constant 1 : index
    %c0_14 = arith.constant 0 : index
    %c0_15 = arith.constant 0 : index
    %16 = vector.load %arg4[%c1, %c0_14, %c0_15] : memref<4x96x96xbf16, #tpu.memory_space<vmem>>, vector<1x96x96xbf16>
    %17 = vector.shape_cast %16 : vector<1x96x96xbf16> to vector<96x96xbf16>
    %cst_16 = arith.constant dense<0.000000e+00> : vector<192x96xf32>
    %18 = tpu.matmul %15, %17, %cst_16 {dimension_numbers = #tpu.dot_dimension_numbers<[1], [0], [0], [1], [0, 0, 1, 1], [], []>} : vector<192x96xbf16>, vector<96x96xbf16>, vector<192x96xf32> -> vector<192x96xf32>
    %c1_17 = arith.constant 1 : index
    %c0_18 = arith.constant 0 : index
    %19 = vector.load %arg5[%c1_17, %c0_18] : memref<4x96xf32, #tpu.memory_space<vmem>>, vector<1x96xf32>
    %20 = vector.broadcast %19 : vector<1x96xf32> to vector<192x96xf32>
    %21 = arith.addf %18, %20 : vector<192x96xf32>
    %22 = arith.truncf %21 : vector<192x96xf32> to vector<192x96xbf16>
    %cst_19 = arith.constant dense<0.000000e+00> : vector<24x96xf32>
    %23 = tpu.matmul %4, %22, %cst_19 {dimension_numbers = #tpu.dot_dimension_numbers<[1], [0], [0], [1], [0, 0, 1, 1], [], []>} : vector<24x192xbf16>, vector<192x96xbf16>, vector<24x96xf32> -> vector<24x96xf32>
    %24 = vector.extract_strided_slice %23 {offsets = [0, 0], sizes = [4, 32], strides = [1, 1]} : vector<24x96xf32> to vector<4x32xf32>
    %25 = vector.extract_strided_slice %23 {offsets = [8, 32], sizes = [4, 32], strides = [1, 1]} : vector<24x96xf32> to vector<4x32xf32>
    %26 = vector.extract_strided_slice %23 {offsets = [16, 64], sizes = [4, 32], strides = [1, 1]} : vector<24x96xf32> to vector<4x32xf32>
    %27 = arith.mulf %24, %26 : vector<4x32xf32>
    %28 = arith.mulf %25, %26 : vector<4x32xf32>
    %cst_20 = arith.constant 0.000000e+00 : f32
    %29 = vector.broadcast %cst_20 : f32 to vector<4x32xf32>
    %30 = tpu.concatenate %27, %28, %29 in 1 : vector<4x32xf32>, vector<4x32xf32>, vector<4x32xf32> -> vector<4x96xf32>
    %31 = arith.truncf %30 : vector<4x96xf32> to vector<4x96xbf16>
    %c2 = arith.constant 2 : index
    %c0_21 = arith.constant 0 : index
    %c0_22 = arith.constant 0 : index
    %32 = vector.load %arg4[%c2, %c0_21, %c0_22] : memref<4x96x96xbf16, #tpu.memory_space<vmem>>, vector<1x96x96xbf16>
    %33 = vector.shape_cast %32 : vector<1x96x96xbf16> to vector<96x96xbf16>
    %cst_23 = arith.constant dense<0.000000e+00> : vector<4x96xf32>
    %34 = tpu.matmul %31, %33, %cst_23 {dimension_numbers = #tpu.dot_dimension_numbers<[1], [0], [0], [1], [0, 0, 1, 1], [], []>} : vector<4x96xbf16>, vector<96x96xbf16>, vector<4x96xf32> -> vector<4x96xf32>
    %c2_24 = arith.constant 2 : index
    %c0_25 = arith.constant 0 : index
    %35 = vector.load %arg5[%c2_24, %c0_25] : memref<4x96xf32, #tpu.memory_space<vmem>>, vector<1x96xf32>
    %36 = vector.broadcast %35 : vector<1x96xf32> to vector<4x96xf32>
    %37 = arith.addf %34, %36 : vector<4x96xf32>
    %cst_26 = arith.constant 0.000000e+00 : f32
    %38 = vector.broadcast %cst_26 : f32 to vector<4x96xf32>
    %39 = arith.maximumf %37, %38 : vector<4x96xf32>
    %40 = arith.truncf %39 : vector<4x96xf32> to vector<4x96xbf16>
    %c3 = arith.constant 3 : index
    %c0_27 = arith.constant 0 : index
    %c0_28 = arith.constant 0 : index
    %41 = vector.load %arg4[%c3, %c0_27, %c0_28] : memref<4x96x96xbf16, #tpu.memory_space<vmem>>, vector<1x96x96xbf16>
    %42 = vector.shape_cast %41 : vector<1x96x96xbf16> to vector<96x96xbf16>
    %cst_29 = arith.constant dense<0.000000e+00> : vector<4x96xf32>
    %43 = tpu.matmul %40, %42, %cst_29 {dimension_numbers = #tpu.dot_dimension_numbers<[1], [0], [0], [1], [0, 0, 1, 1], [], []>} : vector<4x96xbf16>, vector<96x96xbf16>, vector<4x96xf32> -> vector<4x96xf32>
    %c3_30 = arith.constant 3 : index
    %c0_31 = arith.constant 0 : index
    %44 = vector.load %arg5[%c3_30, %c0_31] : memref<4x96xf32, #tpu.memory_space<vmem>>, vector<1x96xf32>
    %45 = vector.broadcast %44 : vector<1x96xf32> to vector<4x96xf32>
    %46 = arith.addf %43, %45 : vector<4x96xf32>
    %47 = vector.extract_strided_slice %46 {offsets = [0, 0], sizes = [4, 8], strides = [1, 1]} : vector<4x96xf32> to vector<4x8xf32>
    %48 = vector.extract_strided_slice %46 {offsets = [0, 32], sizes = [4, 8], strides = [1, 1]} : vector<4x96xf32> to vector<4x8xf32>
    %49 = arith.mulf %47, %48 : vector<4x8xf32>
    %cst_32 = arith.constant dense<0.000000e+00> : vector<4xf32>
    %50 = vector.multi_reduction <add>, %49, %cst_32 [1] : vector<4x8xf32> to vector<4xf32>
    %51 = vector.shape_cast %50 : vector<4xf32> to vector<4x1xf32>
    %c0_33 = arith.constant 0 : index
    %c0_34 = arith.constant 0 : index
    %c0_35 = arith.constant 0 : index
    %52 = vector.load %arg6[%c0_33, %c0_34, %c0_35] : memref<1x4x1xf32, #tpu.memory_space<vmem>>, vector<1x4x1xf32>
    %53 = vector.shape_cast %52 : vector<1x4x1xf32> to vector<4x1xf32>
    %54 = arith.addf %51, %53 : vector<4x1xf32>
    %55 = arith.negf %54 : vector<4x1xf32>
    %56 = math.exp %55 : vector<4x1xf32>
    %cst_36 = arith.constant 1.000000e+00 : f32
    %57 = vector.broadcast %cst_36 : f32 to vector<4x1xf32>
    %58 = arith.addf %57, %56 : vector<4x1xf32>
    %59 = arith.divf %57, %58 : vector<4x1xf32>
    %c0_37 = arith.constant 0 : index
    %c0_38 = arith.constant 0 : index
    %c0_39 = arith.constant 0 : index
    %60 = vector.load %arg7[%c0_37, %c0_38, %c0_39] : memref<1x4x1xf32, #tpu.memory_space<vmem>>, vector<1x4x1xf32>
    %61 = vector.shape_cast %60 : vector<1x4x1xf32> to vector<4x1xf32>
    %62 = vector.shape_cast %59 : vector<4x1xf32> to vector<1x4x1xf32>
    tpu.vector_store %arg7[%c0_37, %c0_38, %c0_39], %62 {strides = array<i32>} : memref<1x4x1xf32, #tpu.memory_space<vmem>>, vector<1x4x1xf32>,
    return
  }
  func.func @transform_0(%arg0: i32) -> (i32, i32, i32) {
    %c0_i32 = arith.constant 0 : i32
    %c0_i32_0 = arith.constant 0 : i32
    %c0_i32_1 = arith.constant 0 : i32
    return %arg0, %c0_i32, %c0_i32_0 : i32, i32, i32
  }
  func.func @transform_1(%arg0: i32) -> (i32, i32, i32) {
    %c0_i32 = arith.constant 0 : i32
    %c0_i32_0 = arith.constant 0 : i32
    %c0_i32_1 = arith.constant 0 : i32
    return %arg0, %c0_i32, %c0_i32_0 : i32, i32, i32
  }
  func.func @transform_2(%arg0: i32) -> (i32, i32) {
    %c0_i32 = arith.constant 0 : i32
    %c0_i32_0 = arith.constant 0 : i32
    %c0_i32_1 = arith.constant 0 : i32
    return %c0_i32, %c0_i32_0 : i32, i32
  }
  func.func @transform_3(%arg0: i32) -> (i32, i32, i32) {
    %c0_i32 = arith.constant 0 : i32
    %c0_i32_0 = arith.constant 0 : i32
    %c0_i32_1 = arith.constant 0 : i32
    %c0_i32_2 = arith.constant 0 : i32
    return %c0_i32, %c0_i32_0, %c0_i32_1 : i32, i32, i32
  }
  func.func @transform_4(%arg0: i32) -> (i32, i32) {
    %c0_i32 = arith.constant 0 : i32
    %c0_i32_0 = arith.constant 0 : i32
    %c0_i32_1 = arith.constant 0 : i32
    return %c0_i32, %c0_i32_0 : i32, i32
  }
  func.func @transform_5(%arg0: i32) -> (i32, i32, i32) {
    %c0_i32 = arith.constant 0 : i32
    %c0_i32_0 = arith.constant 0 : i32
    %c0_i32_1 = arith.constant 0 : i32
    return %arg0, %c0_i32, %c0_i32_0 : i32, i32, i32
  }
  func.func @transform_6(%arg0: i32) -> (i32, i32, i32) {
    %c0_i32 = arith.constant 0 : i32
    %c0_i32_0 = arith.constant 0 : i32
    %c0_i32_1 = arith.constant 0 : i32
    return %arg0, %c0_i32, %c0_i32_0 : i32, i32, i32
  }
}

</mosaic_0001>

<bundles_post_ra>
// kernel: iedr_forward.1
= control target key start
LH: loop header
LB: loop body
LE: loop exit
PB: predicated region body
PF: predicated region fallthrough
CT: control target
= control target key end

     0   :  { %s1844_s21 = smov 0   ;;  %s2122_s0 = inlined_call_operand.vmem [shape: bf16[2,192,96], index: 0, kind: input, shape index: {}]   ;;  %s2123_s1 = inlined_call_operand.vmem [shape: bf16[2,192,192], index: 1, kind: input, shape index: {}]   ;;  %s2124_s2 = inlined_call_operand.vmem [shape: bf16[24,192], index: 2, kind: input, shape index: {}]   ;;  %s2125_s3 = inlined_call_operand.vmem [shape: bf16[4,96,96], index: 3, kind: input, shape index: {}]   ;;  %s2126_s4 = inlined_call_operand.vmem [shape: f32[4,96], index: 4, kind: input, shape index: {}]   ;;  %s2127_s5 = inlined_call_operand.vmem [shape: f32[2,4,1], index: 5, kind: input, shape index: {}]   ;;  %s2128_s6 = inlined_call_operand.vmem [shape: f32[2,4,1], index: 6, kind: output, shape index: {}]  }
   0x1 LB: > { %s1381_s22 = sadd.s32 4294967295, %s1805_s21   ;;  %p1385_p0 = scmp.ge.s32.totalorder %s1805_s21, 1  ;;  %s1805_s21 = sphi %s1844_s21, %s16_s21  }
   0x2   : > { %p231_p1 = scmp.lt.s32.totalorder %s1805_s21, 3 }
   0x4   : > { %p232_p2 = pnand %p1385_p0, %p231_p1 }
   0x5   : > { %p269_p3 = scmp.lt.s32.totalorder (!%p232_p2), %s1381_s22, 1  ;;  %s1807_s7 = smov (!%p232_p2), 64  }
   0x6   : > { %235 = sbr.rel (%p232_p2) target bundleno = 1476 (0x5c4), region = 44  ;;  %s1808_s8 = smov (!%p232_p2), 96  }
   0xb   : > { %s2130_s22 = smov (!%p269_p3, %s1381_s22), 1  ;;  %vm519_vm0 = vcmask 523264   ;;  %v1760_v51 = vld [vmem:[%s2125_s3 + $0x28] sm:$0xff]  ;;  %v1759_v52 = vld [vmem:[%s2125_s3 + $0x20] sm:$0xff]  ;;  %v1758_v53 = vld [vmem:[%s2125_s3 + $0x18] sm:$0xff]  ;;  %vm756_vm1 = vcmask 785408  }
   0xc   : > { %s1779_s23 = smul.u32 96, %s2130_s22  ;;  %795 = vmatpush.bf16.msra.mxu2 %v1760_v51  ;;  %v1757_v60 = vld [vmem:[%s2125_s3 + $0x10] sm:$0xff]  ;;  %v1756_v61 = vld [vmem:[%s2125_s3 + $0x8] sm:$0xff]  ;;  %v1755_v62 = vld [vmem:[%s2125_s3] sm:$0xff]  ;;  %vm1132_vm2 = vcmask 261120   ;;  %vm1277_vm3 = vcmask 60416  }
   0xd   : > { %s1780_s27 = smul.u32 192, %s2130_s22  ;;  %s1388_s10 = sshll.u32 %s2130_s22, 2  ;;  %vm1302_vm6 = vcmask 3072  }
   0xe   : > { %s273_s26 = scalar_lea.vmem %s2122_s0, %s1779_s23  ;;  %s282_s13 = scalar_lea.vmem %s2127_s5, %s1388_s10 }
   0xf   : > { %v1724_v0 = vld [vmem:[%s273_s26 + $0x38] sm:$0xff]  ;;  %v1723_v2 = vld [vmem:[%s273_s26 + $0x30] sm:$0xff]  ;;  %v1722_v4 = vld [vmem:[%s273_s26 + $0x28] sm:$0xff]  ;;  %s1862_s30 = scalar_lea.vmem %s2123_s1, %s1780_s27  ;;  %s286_s14 = scalar_lea.vmem %s2128_s6, %s1388_s10 }
  0x10   : > { %v1728_v1 = vld [vmem:[%s273_s26 + $0x58] sm:$0xff]  ;;  %556 = vmatpush.bf16.msra.mxu0 %v1724_v0  ;;  %v1727_v3 = vld [vmem:[%s273_s26 + $0x50] sm:$0xff]  ;;  %v1726_v5 = vld [vmem:[%s273_s26 + $0x48] sm:$0xff]  ;;  %796 = vmatpush.bf16.msra.mxu2 %v1759_v52 }
  0x11   : > { %629 = vmatpush.bf16.msra.mxu1 %v1728_v1  ;;  %v1721_v6 = vld [vmem:[%s273_s26 + $0x20] sm:$0xff]  ;;  %v1394_v9 = vld [vmem:[%s1862_s30 + $0x8] sm:$0xf0]  ;;  %v1720_v10 = vld [vmem:[%s273_s26 + $0x18] sm:$0xff] }
  0x12   : > { %v1725_v7 = vld [vmem:[%s273_s26 + $0x40] sm:$0xff]  ;;  %v1719_v12 = vld [vmem:[%s273_s26 + $0x10] sm:$0xff]  ;;  %v1718_v13 = vld [vmem:[%s273_s26 + $0x8] sm:$0xff] }
  0x13   : > { %v1729_v8 = vld [vmem:[%s1862_s30 + $0x4] sm:$0xf]  ;;  %v1392_v15 = vld [vmem:[%s1862_s30] sm:$0xf]  ;;  %v1730_v16 = vld [vmem:[%s1862_s30 + $0x4] sm:$0xf0] }
  0x14   : > { %557 = vmatpush.bf16.msra.mxu0 %v1723_v2  ;;  %v1397_v11 = vor.u32 %v1729_v8, %v1394_v9  ;;  %v1717_v14 = vld [vmem:[%s273_s26] sm:$0xff]  ;;  %v1731_v17 = vld [vmem:[%s1862_s30 + $0x14] sm:$0xf]  ;;  %v1402_v18 = vld [vmem:[%s1862_s30 + $0x18] sm:$0xf0]  ;;  %v1393_v19 = vor.u32 %v1730_v16, %v1392_v15  ;;  %797 = vmatpush.bf16.msra.mxu2 %v1758_v53 }
  0x15   : > { %630 = vmatpush.bf16.msra.mxu1 %v1727_v3  ;;  %v1405_v20 = vor.u32 %v1731_v17, %v1402_v18  ;;  %v1400_v21 = vld [vmem:[%s1862_s30 + $0x10] sm:$0xf]  ;;  %v1732_v22 = vld [vmem:[%s1862_s30 + $0x14] sm:$0xf0]  ;;  %v1733_v23 = vld [vmem:[%s1862_s30 + $0x24] sm:$0xf] }
  0x16   : > { %v1410_v24 = vld [vmem:[%s1862_s30 + $0x28] sm:$0xf0]  ;;  %v1401_v25 = vor.u32 %v1732_v22, %v1400_v21  ;;  %v1408_v27 = vld [vmem:[%s1862_s30 + $0x20] sm:$0xf]  ;;  %v1734_v28 = vld [vmem:[%s1862_s30 + $0x24] sm:$0xf0] }
  0x17   : > { %v1413_v26 = vor.u32 %v1733_v23, %v1410_v24  ;;  %v1735_v29 = vld [vmem:[%s1862_s30 + $0x34] sm:$0xf]  ;;  %v1418_v30 = vld [vmem:[%s1862_s30 + $0x38] sm:$0xf0]  ;;  %v1409_v31 = vor.u32 %v1734_v28, %v1408_v27  ;;  %v1416_v33 = vld [vmem:[%s1862_s30 + $0x30] sm:$0xf] }
  0x18   : > { %558 = vmatpush.bf16.msra.mxu0 %v1722_v4  ;;  %v1421_v32 = vor.u32 %v1735_v29, %v1418_v30  ;;  %v1736_v34 = vld [vmem:[%s1862_s30 + $0x34] sm:$0xf0]  ;;  %v1737_v35 = vld [vmem:[%s1862_s30 + $0x44] sm:$0xf]  ;;  %v1426_v36 = vld [vmem:[%s1862_s30 + $0x48] sm:$0xf0]  ;;  %798 = vmatpush.bf16.msra.mxu2 %v1757_v60 }
  0x19   : > { %631 = vmatpush.bf16.msra.mxu1 %v1726_v5  ;;  %v1417_v37 = vor.u32 %v1736_v34, %v1416_v33  ;;  %v1429_v38 = vor.u32 %v1737_v35, %v1426_v36  ;;  %v1424_v39 = vld [vmem:[%s1862_s30 + $0x40] sm:$0xf]  ;;  %v1738_v40 = vld [vmem:[%s1862_s30 + $0x44] sm:$0xf0]  ;;  %v1739_v41 = vld [vmem:[%s1862_s30 + $0x54] sm:$0xf] }
  0x1a   : > { %v1434_v42 = vld [vmem:[%s1862_s30 + $0x58] sm:$0xf0]  ;;  %v1425_v43 = vor.u32 %v1738_v40, %v1424_v39  ;;  %v1432_v45 = vld [vmem:[%s1862_s30 + $0x50] sm:$0xf]  ;;  %v1740_v46 = vld [vmem:[%s1862_s30 + $0x54] sm:$0xf0] }
  0x1b   : > { %v1437_v44 = vor.u32 %v1739_v41, %v1434_v42  ;;  %v1741_v47 = vld [vmem:[%s1862_s30 + $0x64] sm:$0xf]  ;;  %v1442_v48 = vld [vmem:[%s1862_s30 + $0x68] sm:$0xf0]  ;;  %v1433_v49 = vor.u32 %v1740_v46, %v1432_v45  ;;  %v1440_v54 = vld [vmem:[%s1862_s30 + $0x60] sm:$0xf] }
  0x1c   : > { %559 = vmatpush.bf16.msra.mxu0 %v1721_v6  ;;  %v1445_v50 = vor.u32 %v1741_v47, %v1442_v48  ;;  %v1742_v55 = vld [vmem:[%s1862_s30 + $0x64] sm:$0xf0]  ;;  %v1743_v56 = vld [vmem:[%s1862_s30 + $0x74] sm:$0xf]  ;;  %v1450_v57 = vld [vmem:[%s1862_s30 + $0x78] sm:$0xf0]  ;;  %799 = vmatpush.bf16.msra.mxu2 %v1756_v61 }
  0x1d   : > { %632 = vmatpush.bf16.msra.mxu1 %v1725_v7  ;;  %v1441_v58 = vor.u32 %v1742_v55, %v1440_v54  ;;  %v1453_v59 = vor.u32 %v1743_v56, %v1450_v57  ;;  %v1448_v63 = vld [vmem:[%s1862_s30 + $0x70] sm:$0xf]  ;;  %v1744_v0 = vld [vmem:[%s1862_s30 + $0x74] sm:$0xf0]  ;;  %v1745_v1 = vld [vmem:[%s1862_s30 + $0x84] sm:$0xf] }
  0x1e   : > { %v1458_v2 = vld [vmem:[%s1862_s30 + $0x88] sm:$0xf0]  ;;  %v1449_v3 = vor.u32 %v1744_v0, %v1448_v63  ;;  %v1456_v7 = vld [vmem:[%s1862_s30 + $0x80] sm:$0xf]  ;;  %v1746_v8 = vld [vmem:[%s1862_s30 + $0x84] sm:$0xf0] }
  0x1f   : > { %v1461_v4 = vor.u32 %v1745_v1, %v1458_v2  ;;  %v1747_v9 = vld [vmem:[%s1862_s30 + $0x94] sm:$0xf]  ;;  %v1748_v21 = vld [vmem:[%s1862_s30 + $0x94] sm:$0xf0]  ;;  %v1749_v22 = vld [vmem:[%s1862_s30 + $0xa4] sm:$0xf] }
  0x20   : > { %560 = vmatpush.bf16.msra.mxu0 %v1720_v10  ;;  %1534 = vmatmul.msk.bf16.vlgmr.msra.gmra.mxu1 %vm519_vm0, %v1397_v11  ;;  %v1466_v10 = vld [vmem:[%s1862_s30 + $0x98] sm:$0xf0]  ;;  %v1457_v11 = vor.u32 %v1746_v8, %v1456_v7  ;;  %v1474_v23 = vld [vmem:[%s1862_s30 + $0xa8] sm:$0xf0]  ;;  %v1472_v33 = vld [vmem:[%s1862_s30 + $0xa0] sm:$0xf] }
  0x21   : > { %800 = vmatpush.bf16.msra.mxu2 %v1755_v62  ;;  %v1750_v34 = vld [vmem:[%s1862_s30 + $0xa4] sm:$0xf0]  ;;  %v1751_v35 = vld [vmem:[%s1862_s30 + $0xb4] sm:$0xf]  ;;  %v1482_v36 = vld [vmem:[%s1862_s30 + $0xb8] sm:$0xf0] }
  0x22   : > { %v1485_v39 = vor.u32 %v1751_v35, %v1482_v36  ;;  %v1480_v46 = vld [vmem:[%s1862_s30 + $0xb0] sm:$0xf]  ;;  %v1752_v47 = vld [vmem:[%s1862_s30 + $0xb4] sm:$0xf0]  ;;  %v1972_v35 = vld [vmem:[%s2126_s4] ss:$0 sm:$0xff] }
  0x23   : > { %v1481_v48 = vor.u32 %v1752_v47, %v1480_v46  ;;  %v1766_v8 = vld [vmem:[%s2125_s3 + $0x58] sm:$0xff] }
  0x24   : > { %561 = vmatpush.bf16.msra.mxu0 %v1719_v12  ;;  %987 = vmatpush.bf16.msra.mxu3 %v1766_v8 }
  0x28   : > { %562 = vmatpush.bf16.msra.mxu0 %v1718_v13  ;;  %v1469_v13 = vor.u32 %v1747_v9, %v1466_v10 }
  0x2c   : > { %563 = vmatpush.bf16.msra.mxu0 %v1717_v14 }
  0x2f   : > { %564 = vmatmul.bf16.vlgmr.msra.gmra.mxu0 %v1393_v19 }
  0x30   : > { %1535 = vmatmul.msk.bf16.gmra.mxu1 %vm519_vm0, %v1405_v20  ;;  %v1464_v20 = vld [vmem:[%s1862_s30 + $0x90] sm:$0xf] }
  0x31   : > { %v1465_v24 = vor.u32 %v1748_v21, %v1464_v20 }
  0x3f   : > { %569 = vmatmul.bf16.gmra.mxu0 %v1401_v25 }
  0x40   : > { %1536 = vmatmul.msk.bf16.gmra.mxu1 %vm519_vm0, %v1413_v26  ;;  %v1477_v26 = vor.u32 %v1749_v22, %v1474_v23  ;;  %v1761_v23 = vld [vmem:[%s2125_s3 + $0x30] sm:$0xff] }
  0x4f   : > { %574 = vmatmul.bf16.gmra.mxu0 %v1409_v31 }
  0x50   : > { %1537 = vmatmul.msk.bf16.gmra.mxu1 %vm519_vm0, %v1421_v32 }
  0x5f   : > { %579 = vmatmul.bf16.gmra.mxu0 %v1417_v37  ;;  %v1473_v37 = vor.u32 %v1750_v34, %v1472_v33 }
  0x60   : > { %1538 = vmatmul.msk.bf16.gmra.mxu1 %vm519_vm0, %v1429_v38 }
  0x6f   : > { %584 = vmatmul.bf16.gmra.mxu0 %v1425_v43 }
  0x70   : > { %1539 = vmatmul.msk.bf16.gmra.mxu1 %vm519_vm0, %v1437_v44 }
  0x7f   : > { %589 = vmatmul.bf16.gmra.mxu0 %v1433_v49 }
  0x80   : > { %1540 = vmatmul.msk.bf16.gmra.mxu1 %vm519_vm0, %v1445_v50 }
  0x8f   : > { %594 = vmatmul.bf16.gmra.mxu0 %v1441_v58 }
  0x90   : > { %1541 = vmatmul.msk.bf16.gmra.mxu1 %vm519_vm0, %v1453_v59 }
  0x9d   : > { %v634_v5 = vpop.f32.mrf.mxu1 }
  0x9f   : > { %599 = vmatmul.bf16.gmra.mxu0 %v1449_v3 }
  0xa0   : > { %1542 = vmatmul.msk.bf16.gmra.mxu1 %vm519_vm0, %v1461_v4 }
  0xa5   : > { %v636_v6 = vpop.f32.mrf.mxu1 }
  0xac   : > { %v565_v12 = vpop.f32.mrf.mxu0 }
  0xad   : > { %v639_v14 = vpop.f32.mrf.mxu1  ;;  %v635_v16 = vadd.f32 %v634_v5, %v565_v12 }
  0xaf   : > { %604 = vmatmul.bf16.gmra.mxu0 %v1457_v11 }
  0xb0   : > { %1543 = vmatmul.msk.bf16.gmra.mxu1 %vm519_vm0, %v1469_v13  ;;  %v1765_v13 = vld [vmem:[%s2125_s3 + $0x50] sm:$0xff] }
  0xb1   : > { %988 = vmatpush.bf16.msra.mxu3 %v1765_v13 }
  0xb4   : > { %v567_v15 = vpop.f32.mrf.mxu0 }
  0xb5   : > { %v637_v17 = vadd.f32 %v636_v6, %v567_v15  ;;  %v641_v18 = vpop.f32.mrf.mxu1  ;;  %v1764_v15 = vld [vmem:[%s2125_s3 + $0x48] sm:$0xff] }
  0xb6   : > { %989 = vmatpush.bf16.msra.mxu3 %v1764_v15 }
  0xb7   : > { %v694_v19 = vpack.c.bf16 %v637_v17, %v635_v16 }
  0xb9   : > { %1570 = vmatmul.msk.bf16.vlgmr.msra.gmra.mxu2 %vm756_vm1, %v694_v19  ;;  %v1762_v19 = vld [vmem:[%s2125_s3 + $0x38] sm:$0xff] }
  0xbc   : > { %v570_v25 = vpop.f32.mrf.mxu0 }
  0xbd   : > { %v644_v27 = vpop.f32.mrf.mxu1  ;;  %v640_v29 = vadd.f32 %v639_v14, %v570_v25 }
  0xbf   : > { %609 = vmatmul.bf16.gmra.mxu0 %v1465_v24 }
  0xc0   : > { %1544 = vmatmul.msk.bf16.gmra.mxu1 %vm519_vm0, %v1477_v26 }
  0xc4   : > { %v572_v28 = vpop.f32.mrf.mxu0 }
  0xc5   : > { %v642_v30 = vadd.f32 %v641_v18, %v572_v28  ;;  %v646_v31 = vpop.f32.mrf.mxu1  ;;  %v1763_v18 = vld [vmem:[%s2125_s3 + $0x40] sm:$0xff] }
  0xc6   : > { %990 = vmatpush.bf16.msra.mxu3 %v1763_v18 }
  0xc7   : > { %v695_v32 = vpack.c.bf16 %v642_v30, %v640_v29 }
  0xc9   : > { %1571 = vmatmul.msk.bf16.gmra.mxu2 %vm756_vm1, %v695_v32 }
  0xca   : > { %991 = vmatpush.bf16.msra.mxu3 %v1762_v19 }
  0xcc   : > { %v575_v38 = vpop.f32.mrf.mxu0 }
  0xcd   : > { %v649_v40 = vpop.f32.mrf.mxu1  ;;  %v645_v42 = vadd.f32 %v644_v27, %v575_v38 }
  0xce   : > { %992 = vmatpush.bf16.msra.mxu3 %v1761_v23 }
  0xcf   : > { %614 = vmatmul.bf16.gmra.mxu0 %v1473_v37 }
  0xd0   : > { %1545 = vmatmul.msk.bf16.gmra.mxu1 %vm519_vm0, %v1485_v39 }
  0xd4   : > { %v577_v41 = vpop.f32.mrf.mxu0 }
  0xd5   : > { %v647_v43 = vadd.f32 %v646_v31, %v577_v41  ;;  %v651_v44 = vpop.f32.mrf.mxu1 }
  0xd7   : > { %v696_v45 = vpack.c.bf16 %v647_v43, %v645_v42 }
  0xd9   : > { %1572 = vmatmul.msk.bf16.gmra.mxu2 %vm756_vm1, %v696_v45 }
  0xdc   : > { %v580_v49 = vpop.f32.mrf.mxu0 }
  0xdd   : > { %v654_v50 = vpop.f32.mrf.mxu1  ;;  %v650_v52 = vadd.f32 %v649_v40, %v580_v49 }
  0xdf   : > { %619 = vmatmul.bf16.gmra.mxu0 %v1481_v48 }
  0xe4   : > { %v582_v51 = vpop.f32.mrf.mxu0 }
  0xe5   : > { %v652_v53 = vadd.f32 %v651_v44, %v582_v51  ;;  %v656_v54 = vpop.f32.mrf.mxu1 }
  0xe7   : > { %v697_v55 = vpack.c.bf16 %v652_v53, %v650_v52 }
  0xe9   : > { %1573 = vmatmul.msk.bf16.gmra.mxu2 %vm756_vm1, %v697_v55 }
  0xec   : > { %v585_v56 = vpop.f32.mrf.mxu0 }
  0xed   : > { %v659_v57 = vpop.f32.mrf.mxu1  ;;  %v655_v59 = vadd.f32 %v654_v50, %v585_v56 }
  0xf4   : > { %v587_v58 = vpop.f32.mrf.mxu0 }
  0xf5   : > { %v657_v60 = vadd.f32 %v656_v54, %v587_v58  ;;  %v661_v61 = vpop.f32.mrf.mxu1 }
  0xf7   : > { %v698_v62 = vpack.c.bf16 %v657_v60, %v655_v59 }
  0xf9   : > { %1574 = vmatmul.msk.bf16.gmra.mxu2 %vm756_vm1, %v698_v62 }
  0xfc   : > { %v590_v63 = vpop.f32.mrf.mxu0 }
  0xfd   : > { %v664_v0 = vpop.f32.mrf.mxu1  ;;  %v660_v2 = vadd.f32 %v659_v57, %v590_v63 }
 0x104   : > { %v592_v1 = vpop.f32.mrf.mxu0 }
 0x105   : > { %v662_v3 = vadd.f32 %v661_v61, %v592_v1  ;;  %v666_v4 = vpop.f32.mrf.mxu1 }
 0x107   : > { %v699_v5 = vpack.c.bf16 %v662_v3, %v660_v2 }
 0x109   : > { %1575 = vmatmul.msk.bf16.gmra.mxu2 %vm756_vm1, %v699_v5 }
 0x10c   : > { %v595_v6 = vpop.f32.mrf.mxu0 }
 0x10d   : > { %v669_v7 = vpop.f32.mrf.mxu1  ;;  %v665_v10 = vadd.f32 %v664_v0, %v595_v6 }
 0x114   : > { %v597_v9 = vpop.f32.mrf.mxu0 }
 0x115   : > { %v667_v11 = vadd.f32 %v666_v4, %v597_v9  ;;  %v671_v12 = vpop.f32.mrf.mxu1 }
 0x117   : > { %v700_v14 = vpack.c.bf16 %v667_v11, %v665_v10 }
 0x119   : > { %1576 = vmatmul.msk.bf16.gmra.mxu2 %vm756_vm1, %v700_v14 }
 0x11c   : > { %v600_v16 = vpop.f32.mrf.mxu0 }
 0x11d   : > { %v674_v17 = vpop.f32.mrf.mxu1  ;;  %v670_v21 = vadd.f32 %v669_v7, %v600_v16 }
 0x124   : > { %v602_v20 = vpop.f32.mrf.mxu0 }
 0x125   : > { %v672_v22 = vadd.f32 %v671_v12, %v602_v20  ;;  %v676_v25 = vpop.f32.mrf.mxu1 }
 0x127   : > { %v701_v24 = vpack.c.bf16 %v672_v22, %v670_v21 }
 0x129   : > { %1577 = vmatmul.msk.bf16.gmra.mxu2 %vm756_vm1, %v701_v24 }
 0x12c   : > { %v605_v26 = vpop.f32.mrf.mxu0 }
 0x12d   : > { %v679_v27 = vpop.f32.mrf.mxu1  ;;  %v675_v29 = vadd.f32 %v674_v17, %v605_v26 }
 0x134   : > { %v607_v28 = vpop.f32.mrf.mxu0 }
 0x135   : > { %v677_v30 = vadd.f32 %v676_v25, %v607_v28  ;;  %v681_v32 = vpop.f32.mrf.mxu1 }
 0x137   : > { %v702_v31 = vpack.c.bf16 %v677_v30, %v675_v29 }
 0x139   : > { %1578 = vmatmul.msk.bf16.gmra.mxu2 %vm756_vm1, %v702_v31 }
 0x13c   : > { %v610_v33 = vpop.f32.mrf.mxu0  ;;  %v802_v34 = vpop.f32.mrf.mxu2 }
 0x13d   : > { %v803_v36 = vadd.f32 %v1972_v35, %v802_v34  ;;  %v680_v39 = vadd.f32 %v679_v27, %v610_v33  ;;  %v684_v41 = vpop.f32.mrf.mxu1 }
 0x13f   : > { %v862_v43 = vmax.f32 %v803_v36, 0.0 }
 0x144   : > { %v612_v37 = vpop.f32.mrf.mxu0  ;;  %v804_v38 = vpop.f32.mrf.mxu2 }
 0x145   : > { %v682_v40 = vadd.f32 %v681_v32, %v612_v37  ;;  %v805_v42 = vadd.f32 %v1972_v35, %v804_v38  ;;  %v686_v49 = vpop.f32.mrf.mxu1 }
 0x147   : > { %v703_v44 = vpack.c.bf16 %v682_v40, %v680_v39  ;;  %v863_v45 = vmax.f32 %v805_v42, 0.0 }
 0x149   : > { %1579 = vmatmul.msk.bf16.gmra.mxu2 %vm756_vm1, %v703_v44  ;;  %v886_v46 = vpack.c.bf16 %v863_v45, %v862_v43 }
 0x14b   : > { %1618 = vmatmul.msk.bf16.vlgmr.msra.gmra.mxu3 %vm756_vm1, %v886_v46 }
 0x14c   : > { %v615_v47 = vpop.f32.mrf.mxu0  ;;  %v807_v48 = vpop.f32.mrf.mxu2 }
 0x14d   : > { %v808_v50 = vadd.f32 %v1972_v35, %v807_v48  ;;  %v685_v53 = vadd.f32 %v684_v41, %v615_v47  ;;  %v689_v59 = vpop.f32.mrf.mxu1 }
 0x14f   : > { %v864_v56 = vmax.f32 %v808_v50, 0.0 }
 0x154   : > { %v617_v51 = vpop.f32.mrf.mxu0  ;;  %v809_v52 = vpop.f32.mrf.mxu2 }
 0x155   : > { %v687_v54 = vadd.f32 %v686_v49, %v617_v51  ;;  %v810_v55 = vadd.f32 %v1972_v35, %v809_v52  ;;  %v691_v63 = vpop.f32.mrf.mxu1 }
 0x157   : > { %v704_v57 = vpack.c.bf16 %v687_v54, %v685_v53  ;;  %v865_v58 = vmax.f32 %v810_v55, 0.0 }
 0x159   : > { %1580 = vmatmul.msk.bf16.gmra.mxu2 %vm756_vm1, %v704_v57  ;;  %v887_v60 = vpack.c.bf16 %v865_v58, %v864_v56 }
 0x15b   : > { %1619 = vmatmul.msk.bf16.gmra.mxu3 %vm756_vm1, %v887_v60 }
 0x15c   : > { %v620_v61 = vpop.f32.mrf.mxu0  ;;  %v812_v62 = vpop.f32.mrf.mxu2 }
 0x15d   : > { %v813_v0 = vadd.f32 %v1972_v35, %v812_v62  ;;  %v690_v3 = vadd.f32 %v689_v59, %v620_v61 }
 0x15f   : > { %v866_v6 = vmax.f32 %v813_v0, 0.0 }
 0x164   : > { %v622_v1 = vpop.f32.mrf.mxu0  ;;  %v814_v2 = vpop.f32.mrf.mxu2 }
 0x165   : > { %v692_v4 = vadd.f32 %v691_v63, %v622_v1  ;;  %v815_v5 = vadd.f32 %v1972_v35, %v814_v2  ;;  %v2015_v2 = vld [vmem:[%s2126_s4 + $0x1] ss:$0 sm:$0xff] }
 0x167   : > { %v705_v7 = vpack.c.bf16 %v692_v4, %v690_v3  ;;  %v867_v8 = vmax.f32 %v815_v5, 0.0 }
 0x169   : > { %v888_v9 = vpack.c.bf16 %v867_v8, %v866_v6  ;;  %1581 = vmatmul.msk.bf16.gmra.mxu2 %vm756_vm1, %v705_v7 }
 0x16b   : > { %1620 = vmatmul.msk.bf16.gmra.mxu3 %vm756_vm1, %v888_v9 }
 0x16c   : > { %v817_v10 = vpop.f32.mrf.mxu2 }
 0x16d   : > { %v818_v11 = vadd.f32 %v1972_v35, %v817_v10 }
 0x16f   : > { %v868_v14 = vmax.f32 %v818_v11, 0.0 }
 0x174   : > { %v819_v12 = vpop.f32.mrf.mxu2 }
 0x175   : > { %v820_v13 = vadd.f32 %v1972_v35, %v819_v12 }
 0x177   : > { %v869_v15 = vmax.f32 %v820_v13, 0.0 }
 0x179   : > { %v889_v16 = vpack.c.bf16 %v869_v15, %v868_v14 }
 0x17b   : > { %1621 = vmatmul.msk.bf16.gmra.mxu3 %vm756_vm1, %v889_v16 }
 0x17c   : > { %v822_v17 = vpop.f32.mrf.mxu2 }
 0x17d   : > { %v823_v18 = vadd.f32 %v1972_v35, %v822_v17 }
 0x17f   : > { %v870_v21 = vmax.f32 %v823_v18, 0.0 }
 0x184   : > { %v824_v19 = vpop.f32.mrf.mxu2 }
 0x185   : > { %v825_v20 = vadd.f32 %v1972_v35, %v824_v19 }
 0x187   : > { %v871_v22 = vmax.f32 %v825_v20, 0.0 }
 0x189   : > { %v890_v23 = vpack.c.bf16 %v871_v22, %v870_v21 }
 0x18b   : > { %1622 = vmatmul.msk.bf16.gmra.mxu3 %vm756_vm1, %v890_v23 }
 0x18c   : > { %v827_v24 = vpop.f32.mrf.mxu2 }
 0x18d   : > { %v828_v25 = vadd.f32 %v1972_v35, %v827_v24 }
 0x18f   : > { %v872_v28 = vmax.f32 %v828_v25, 0.0 }
 0x194   : > { %v829_v26 = vpop.f32.mrf.mxu2 }
 0x195   : > { %v830_v27 = vadd.f32 %v1972_v35, %v829_v26 }
 0x197   : > { %v873_v29 = vmax.f32 %v830_v27, 0.0 }
 0x199   : > { %v891_v30 = vpack.c.bf16 %v873_v29, %v872_v28 }
 0x19b   : > { %1623 = vmatmul.msk.bf16.gmra.mxu3 %vm756_vm1, %v891_v30 }
 0x19c   : > { %v832_v31 = vpop.f32.mrf.mxu2 }
 0x19d   : > { %v833_v32 = vadd.f32 %v1972_v35, %v832_v31 }
 0x19f   : > { %v874_v36 = vmax.f32 %v833_v32, 0.0 }
 0x1a4   : > { %v834_v33 = vpop.f32.mrf.mxu2 }
 0x1a5   : > { %v835_v34 = vadd.f32 %v1972_v35, %v834_v33 }
 0x1a7   : > { %v875_v37 = vmax.f32 %v835_v34, 0.0 }
 0x1a9   : > { %v892_v38 = vpack.c.bf16 %v875_v37, %v874_v36 }
 0x1ab   : > { %1624 = vmatmul.msk.bf16.gmra.mxu3 %vm756_vm1, %v892_v38 }
 0x1ac   : > { %v837_v39 = vpop.f32.mrf.mxu2 }
 0x1ad   : > { %v838_v40 = vadd.f32 %v1972_v35, %v837_v39 }
 0x1af   : > { %v876_v43 = vmax.f32 %v838_v40, 0.0 }
 0x1b4   : > { %v839_v41 = vpop.f32.mrf.mxu2 }
 0x1b5   : > { %v840_v42 = vadd.f32 %v1972_v35, %v839_v41 }
 0x1b7   : > { %v877_v44 = vmax.f32 %v840_v42, 0.0 }
 0x1b9   : > { %v893_v45 = vpack.c.bf16 %v877_v44, %v876_v43 }
 0x1bb   : > { %1625 = vmatmul.msk.bf16.gmra.mxu3 %vm756_vm1, %v893_v45 }
 0x1bc   : > { %v842_v46 = vpop.f32.mrf.mxu2 }
 0x1bd   : > { %v843_v47 = vadd.f32 %v1972_v35, %v842_v46 }
 0x1bf   : > { %v878_v50 = vmax.f32 %v843_v47, 0.0 }
 0x1c4   : > { %v844_v48 = vpop.f32.mrf.mxu2 }
 0x1c5   : > { %v845_v49 = vadd.f32 %v1972_v35, %v844_v48 }
 0x1c7   : > { %v879_v51 = vmax.f32 %v845_v49, 0.0 }
 0x1c9   : > { %v894_v52 = vpack.c.bf16 %v879_v51, %v878_v50 }
 0x1cb   : > { %1626 = vmatmul.msk.bf16.gmra.mxu3 %vm756_vm1, %v894_v52 }
 0x1cc   : > { %v847_v53 = vpop.f32.mrf.mxu2 }
 0x1cd   : > { %v848_v55 = vadd.f32 %v1972_v35, %v847_v53 }
 0x1ce   : > { %v2004_v54 = vpop.f32.mrf.mxu3 }
 0x1cf   : > { %v880_v59 = vmax.f32 %v848_v55, 0.0  ;;  %v995_v52 = vadd.f32 %v2015_v2, %v2004_v54  ;;  %v338_v54 = vld [vmem:[%s2124_s2 + $0x10] sm:$0xff] }
 0x1d4   : > { %v849_v56 = vpop.f32.mrf.mxu2 }
 0x1d5   : > { %v850_v57 = vadd.f32 %v1972_v35, %v849_v56 }
 0x1d6   : > { %v2008_v58 = vpop.f32.mrf.mxu3 }
 0x1d7   : > { %v881_v60 = vmax.f32 %v850_v57, 0.0  ;;  %v997_v51 = vadd.f32 %v2015_v2, %v2008_v58  ;;  %v1632_v57 = vld [vmem:[%s2124_s2] sm:$0xf] }
 0x1d9   : > { %v895_v61 = vpack.c.bf16 %v881_v60, %v880_v59  ;;  %v1054_v53 = vpack.c.bf16 %v997_v51, %v995_v52  ;;  %v1754_v59 = vld [vmem:[%s2124_s2 + $0x4] sm:$0xf0] }
 0x1db   : > { %1627 = vmatmul.msk.bf16.gmra.mxu3 %vm756_vm1, %v895_v61  ;;  %v1633_v61 = vor.u32 %v1754_v59, %v1632_v57 }
 0x1dc   : > { %v852_v62 = vpop.f32.mrf.mxu2 }
 0x1dd   : > { %v853_v0 = vadd.f32 %v1972_v35, %v852_v62  ;;  %v1073_v62 = vunpack.c.l.b16 %v338_v54 }
 0x1de   : > { %v999_v63 = vpop.f32.mrf.mxu3 }
 0x1df   : > { %v882_v5 = vmax.f32 %v853_v0, 0.0  ;;  %v1000_v6 = vadd.f32 %v2015_v2, %v999_v63  ;;  %v1077_v0 = vpack.c.b16 %v1073_v62, %v1073_v62 }
 0x1e4   : > { %v854_v1 = vpop.f32.mrf.mxu2 }
 0x1e5   : > { %v855_v3 = vadd.f32 %v1972_v35, %v854_v1 }
 0x1e6   : > { %v1001_v4 = vpop.f32.mrf.mxu3 }
 0x1e7   : > { %v883_v7 = vmax.f32 %v855_v3, 0.0  ;;  %v1002_v8 = vadd.f32 %v2015_v2, %v1001_v4 }
 0x1e9   : > { %v896_v9 = vpack.c.bf16 %v883_v7, %v882_v5  ;;  %v1055_v10 = vpack.c.bf16 %v1002_v8, %v1000_v6 }
 0x1eb   : > { %1628 = vmatmul.msk.bf16.gmra.mxu3 %vm756_vm1, %v896_v9 }
 0x1ec   : > { %v857_v11 = vpop.f32.mrf.mxu2 }
 0x1ed   : > { %v858_v13 = vadd.f32 %v1972_v35, %v857_v11 }
 0x1ee   : > { %v1004_v12 = vpop.f32.mrf.mxu3 }
 0x1ef   : > { %v884_v17 = vmax.f32 %v858_v13, 0.0  ;;  %v1005_v18 = vadd.f32 %v2015_v2, %v1004_v12  ;;  %v1753_v13 = vld [vmem:[%s2124_s2 + $0x4] sm:$0xf] }
 0x1f4   : > { %v859_v14 = vpop.f32.mrf.mxu2 }
 0x1f5   : > { %v860_v15 = vadd.f32 %v1972_v35, %v859_v14  ;;  %v1634_v14 = vld [vmem:[%s2124_s2 + $0x8] sm:$0xf0] }
 0x1f6   : > { %v1006_v16 = vpop.f32.mrf.mxu3 }
 0x1f7   : > { %v885_v19 = vmax.f32 %v860_v15, 0.0  ;;  %v1007_v20 = vadd.f32 %v2015_v2, %v1006_v16  ;;  %v1637_v16 = vor.u32 %v1753_v13, %v1634_v14 }
 0x1f9   : > { %v897_v21 = vpack.c.bf16 %v885_v19, %v884_v17  ;;  %v1056_v22 = vpack.c.bf16 %v1007_v20, %v1005_v18  ;;  %v1074_v17 = vunpack.c.h.b16 %v338_v54  ;;  %v1281_v54 = vld [vmem:[%s282_s13] sm:$0xf] }
 0x1fb   : > { %1629 = vmatmul.msk.bf16.gmra.mxu3 %vm756_vm1, %v897_v21  ;;  %v1078_v18 = vpack.c.b16 %v1074_v17, %v1074_v17 }
 0x1fe   : > { %v1009_v23 = vpop.f32.mrf.mxu3 }
 0x1ff   : > { %v1010_v25 = vadd.f32 %v2015_v2, %v1009_v23  ;;  %v1771_v23 = vld [vmem:[%s2125_s3 + $0x80] sm:$0xff] }
 0x206   : > { %v1011_v24 = vpop.f32.mrf.mxu3 }
 0x207   : > { %v1012_v26 = vadd.f32 %v2015_v2, %v1011_v24 }
 0x209   : > { %v1057_v27 = vpack.c.bf16 %v1012_v26, %v1010_v25  ;;  %v1770_v26 = vld [vmem:[%s2125_s3 + $0x78] sm:$0xff] }
 0x20e   : > { %v1014_v28 = vpop.f32.mrf.mxu3 }
 0x20f   : > { %v1015_v47 = vadd.f32 %v2015_v2, %v1014_v28 }
 0x216   : > { %v1016_v35 = vpop.f32.mrf.mxu3 }
 0x217   : > { %v1017_v45 = vadd.f32 %v2015_v2, %v1016_v35 }
 0x219   : > { %v1058_v48 = vpack.c.bf16 %v1017_v45, %v1015_v47  ;;  %v1773_v47 = vld [vmem:[%s2125_s3 + $0x90] sm:$0xff] }
 0x21e   : > { %v1019_v29 = vpop.f32.mrf.mxu3 }
 0x21f   : > { %v1020_v44 = vadd.f32 %v2015_v2, %v1019_v29 }
 0x226   : > { %v1021_v30 = vpop.f32.mrf.mxu3 }
 0x227   : > { %v1022_v41 = vadd.f32 %v2015_v2, %v1021_v30 }
 0x229   : > { %v1059_v46 = vpack.c.bf16 %v1022_v41, %v1020_v44 }
 0x22e   : > { %v1024_v31 = vpop.f32.mrf.mxu3 }
 0x22f   : > { %v1025_v40 = vadd.f32 %v2015_v2, %v1024_v31  ;;  %v1769_v31 = vld [vmem:[%s2125_s3 + $0x70] sm:$0xff] }
 0x236   : > { %v1026_v32 = vpop.f32.mrf.mxu3 }
 0x237   : > { %v1027_v38 = vadd.f32 %v2015_v2, %v1026_v32  ;;  %v1768_v32 = vld [vmem:[%s2125_s3 + $0x68] sm:$0xff] }
 0x239   : > { %v1060_v42 = vpack.c.bf16 %v1027_v38, %v1025_v40  ;;  %v1775_v38 = vld [vmem:[%s2125_s3 + $0xa0] sm:$0xff] }
 0x23e   : > { %v1029_v33 = vpop.f32.mrf.mxu3 }
 0x23f   : > { %v1030_v36 = vadd.f32 %v2015_v2, %v1029_v33  ;;  %v1767_v33 = vld [vmem:[%s2125_s3 + $0x60] sm:$0xff] }
 0x246   : > { %v1031_v34 = vpop.f32.mrf.mxu3 }
 0x247   : > { %v1032_v37 = vadd.f32 %v2015_v2, %v1031_v34  ;;  %v1778_v34 = vld [vmem:[%s2125_s3 + $0xb8] sm:$0xff] }
 0x248   : > { %1261 = vmatpush.bf16.msrb.mxu0 %v1778_v34 }
 0x249   : > { %v1061_v39 = vpack.c.bf16 %v1032_v37, %v1030_v36  ;;  %v1777_v36 = vld [vmem:[%s2125_s3 + $0xb0] sm:$0xff]  ;;  %v1776_v37 = vld [vmem:[%s2125_s3 + $0xa8] sm:$0xff] }
 0x24b   : > { %1087 = vmatpush.bf16.msrb.mxu1 %v1061_v39 }
 0x24c   : > { %1262 = vmatpush.bf16.msrb.mxu0 %v1777_v36 }
 0x24e   : > { %v1034_v43 = vpop.f32.mrf.mxu3 }
 0x24f   : > { %1088 = vmatpush.bf16.msrb.mxu1 %v1060_v42  ;;  %v1035_v12 = vadd.f32 %v2015_v2, %v1034_v43 }
 0x250   : > { %1263 = vmatpush.bf16.msrb.mxu0 %v1776_v37 }
 0x253   : > { %1089 = vmatpush.bf16.msrb.mxu1 %v1059_v46  ;;  %v1774_v46 = vld [vmem:[%s2125_s3 + $0x98] sm:$0xff] }
 0x254   : > { %1264 = vmatpush.bf16.msrb.mxu0 %v1775_v38 }
 0x256   : > { %v1036_v49 = vpop.f32.mrf.mxu3 }
 0x257   : > { %1090 = vmatpush.bf16.msrb.mxu1 %v1058_v48  ;;  %v1793_v48 = vld [vmem:[%s2126_s4 + $0x2] ss:$0 sm:$0xff] }
 0x258   : > { %1265 = vmatpush.bf16.msrb.mxu0 %v1774_v46 }
 0x25b   : > { %1091 = vmatpush.bf16.msrb.mxu1 %v1057_v27 }
 0x25c   : > { %1266 = vmatpush.bf16.msrb.mxu0 %v1773_v47 }
 0x25e   : > { %v1039_v50 = vpop.f32.mrf.mxu3 }
 0x25f   : > { %1092 = vmatpush.bf16.msrb.mxu1 %v1056_v22  ;;  %v1040_v9 = vadd.f32 %v2015_v2, %v1039_v50  ;;  %v1772_v22 = vld [vmem:[%s2125_s3 + $0x88] sm:$0xff] }
 0x260   : > { %1192 = vmatpush.bf16.msrb.mxu3 %v1772_v22 }
 0x263   : > { %1093 = vmatpush.bf16.msrb.mxu1 %v1055_v10  ;;  %v1037_v10 = vadd.f32 %v2015_v2, %v1036_v49 }
 0x264   : > { %1193 = vmatpush.bf16.msrb.mxu3 %v1771_v23 }
 0x265   : > { %v1062_v15 = vpack.c.bf16 %v1037_v10, %v1035_v12 }
 0x266   : > { %v1041_v55 = vpop.f32.mrf.mxu3 }
 0x267   : > { %1094 = vmatpush.bf16.msrb.mxu1 %v1054_v53  ;;  %v1042_v7 = vadd.f32 %v2015_v2, %v1041_v55  ;;  %v1794_v55 = vld [vmem:[%s2126_s4 + $0x3] ss:$0 sm:$0xff] }
 0x268   : > { %1194 = vmatpush.bf16.msrb.mxu3 %v1770_v26 }
 0x269   : > { %v1063_v11 = vpack.c.bf16 %v1042_v7, %v1040_v9 }
 0x26a   : > { %1095 = vmatmul.bf16.vlgmr.msrb.gmra.mxu1 %v1633_v61 }
 0x26c   : > { %1195 = vmatpush.bf16.msrb.mxu3 %v1769_v31 }
 0x26e   : > { %v1044_v56 = vpop.f32.mrf.mxu3 }
 0x26f   : > { %v1045_v6 = vadd.f32 %v2015_v2, %v1044_v56 }
 0x270   : > { %1196 = vmatpush.bf16.msrb.mxu3 %v1768_v32 }
 0x274   : > { %1197 = vmatpush.bf16.msrb.mxu3 %v1767_v33 }
 0x276   : > { %v1046_v60 = vpop.f32.mrf.mxu3 }
 0x277   : > { %v1047_v4 = vadd.f32 %v2015_v2, %v1046_v60 }
 0x279   : > { %v1064_v8 = vpack.c.bf16 %v1047_v4, %v1045_v6 }
 0x27a   : > { %1100 = vmatmul.bf16.gmra.mxu1 %v1077_v0 }
 0x27e   : > { %v1049_v58 = vpop.f32.mrf.mxu3 }
 0x27f   : > { %v1050_v1 = vadd.f32 %v2015_v2, %v1049_v58 }
 0x286   : > { %v1051_v63 = vpop.f32.mrf.mxu3 }
 0x287   : > { %v1052_v3 = vadd.f32 %v2015_v2, %v1051_v63 }
 0x289   : > { %v1065_v5 = vpack.c.bf16 %v1052_v3, %v1050_v1 }
 0x28b   : > { %1109 = vmatpush.bf16.msrb.mxu2 %v1065_v5 }
 0x28f   : > { %1110 = vmatpush.bf16.msrb.mxu2 %v1064_v8 }
 0x293   : > { %1111 = vmatpush.bf16.msrb.mxu2 %v1063_v11 }
 0x297   : > { %1112 = vmatpush.bf16.msrb.mxu2 %v1062_v15 }
 0x29a   : > { %1638 = vmatmul.msk.bf16.vlgmr.msrb.gmra.mxu2 %vm519_vm0, %v1637_v16 }
 0x2aa   : > { %1639 = vmatmul.msk.bf16.gmra.mxu2 %vm519_vm0, %v1078_v18 }
 0x2e7   : > { %v1096_v19 = vpop.f32.mrf.mxu1 }
 0x2ef   : > { %v1098_v2 = vpop.f32.mrf.mxu1 }
 0x2f7   : > { %v1101_v20 = vpop.f32.mrf.mxu1 }
 0x2ff   : > { %v1103_v21 = vpop.f32.mrf.mxu1 }
 0x31d   : > { %v1114_v24 = vpop.f32.mrf.mxu2 }
 0x31e   : > { %v1115_v25 = vadd.f32 %v1114_v24, %v1096_v19 }
 0x325   : > { %v1116_v27 = vpop.f32.mrf.mxu2 }
 0x326   : > { %v1117_v28 = vadd.f32 %v1116_v27, %v1098_v2 }
 0x32d   : > { %v1119_v35 = vpop.f32.mrf.mxu2 }
 0x32e   : > { %v1120_v29 = vadd.f32 %v1119_v35, %v1101_v20 }
 0x330   : > { %1124 = vrot.lane.b32.xlu0 %v1120_v29, %s1807_s7 }
 0x335   : > { %v1121_v30 = vpop.f32.mrf.mxu2 }
 0x338   : > { %1128 = vrot.lane.b32.xlu0 %v1120_v29, %s1808_s8 }
 0x3a2   : > { %v1125_v39 = vpop.permute.xlu0 %1124 }
 0x3a3   : > { %v1127_v41 = vmul.f32 %v1125_v39, %v1115_v25 }
 0x3aa   : > { %v1129_v40 = vpop.permute.xlu0 %1128 }
 0x3ab   : > { %v1131_v42 = vmul.f32 %v1129_v40, %v1117_v28 }
 0x3ad   : > { %v1133_v43 = vsel %vm1132_vm2, %v1127_v41, %v1131_v42 }
 0x3ae   : > { %v1134_v44 = vsel %vm519_vm0, %v1133_v43, 0.0 }
 0x3af   : > { %v1135_v45 = vpack.c.bf16 %v1134_v44, %v1134_v44 }
 0x3b1   : > { %1676 = vmatmul.msk.bf16.vlgmr.msrb.gmra.mxu3 %vm756_vm1, %v1135_v45 }
 0x434   : > { %v1199_v49 = vpop.f32.mrf.mxu3 }
 0x435   : > { %v1200_v50 = vadd.f32 %v1793_v48, %v1199_v49 }
 0x437   : > { %v1203_v51 = vmax.f32 %v1200_v50, 0.0 }
 0x439   : > { %v1204_v52 = vpack.c.bf16 %v1203_v51, %v1203_v51 }
 0x43b   : > { %1713 = vmatmul.msk.bf16.vlgmr.msrb.gmra.mxu0 %vm756_vm1, %v1204_v52 }
 0x43c   : > { %v1201_v53 = vpop.f32.mrf.mxu3 }
 0x4b8   : > { %v1268_v56 = vpop.f32.mrf.mxu0 }
 0x4b9   : > { %v1269_v57 = vadd.f32 %v1794_v55, %v1268_v56 }
 0x4bb   : > { %1273 = vrot.lane.b32.xlu1 %v1269_v57, %s1808_s8 }
 0x4c0   : > { %v1270_v59 = vpop.f32.mrf.mxu0 }
 0x52d   : > { %v1274_v60 = vpop.permute.xlu1 %1273 }
 0x52e   : > { %v1276_v61 = vmul.f32 %v1274_v60, %v1269_v57 }
 0x530   : > { %v1278_v58 = vsel %vm1277_vm3, %v1276_v61, 0.0 }
 0x531   : > { %1279 = vadd.xlane.f32.xlu1 %v1278_v58 }
 0x5a4   : > { %v1280_v62 = vpop.xlane.xlu1 %1279 }
 0x5a5   : > { %v1282_v63 = vadd.f32 %v1281_v54, %v1280_v62 }
 0x5a7   : > { %v1714_v0 = vmul.f32 -1.442695, %v1282_v63 }
 0x5a9   : > { %1795 = vpow2.f32 %v1714_v0 }
 0x5af   : > { %v1796_v1 = vpop.eup %1795 }
 0x5b0   : > { %v1286_v3 = vadd.f32 1.0, %v1796_v1 }
 0x5b2   : > { %1797 = vrcp.f32 %v1286_v3  ;;  %v1298_v7 = vand.u32 2147483648, %v1286_v3  ;;  %v1296_v9 = vand.u32 2147483647, %v1286_v3  ;;  %vm1292_vm5 = vweird.f32 %v1286_v3 }
 0x5b4   : > { %v1299_v11 = vor.u32 1.1754944e-38, %v1298_v7  ;;  %vm1297_vm8 = vcmp.eq.f32.partialorder %v1296_v9, 8.507059e+37 }
 0x5b8   : > { %v1798_v4 = vpop.eup %1797 }
 0x5b9   : > { %v1288_v5 = vmul.f32 %v1798_v4, %v1286_v3  ;;  %vm1293_vm4 = vweird.f32 %v1798_v4 }
 0x5ba   : > { %vm1294_vm7 = vmor %vm1292_vm5, %vm1293_vm4 }
 0x5bb   : > { %v1289_v6 = vsub.f32 1.0, %v1288_v5 }
 0x5bd   : > { %v1290_v8 = vmul.f32 %v1798_v4, %v1289_v6 }
 0x5bf   : > { %v1291_v10 = vadd.f32 %v1798_v4, %v1290_v8 }
 0x5c1   : > { %v1295_v12 = vsel %vm1294_vm7, %v1798_v4, %v1291_v10 }
 0x5c2   : > { %v1300_v13 = vsel %vm1297_vm8, %v1299_v11, %v1295_v12 }
 0x5c3   : > { %1303 = vst.msk [vmem:[%s286_s14] sm:$0xf] %vm1302_vm6, %v1300_v13 }
 0x5c4 PF: > { %s16_s21 = sadd.s32 1, %s1805_s21  }
 0x5c5   : > { %p13_p4 = scmp.ge.s32.totalorder %s16_s21, 4  }
 0x5c7   :  { %15 = sbr.rel (!%p13_p4) target bundleno = 1 (0x1), region = 83 }

</bundles_post_ra>
